<compile_context>
chip_gen: v5e
topology: v5e:2x2
jax: 0.10.0
libtpu: 0.0.40
codegen_flags: <defaults>
</compile_context>

<pallas_src>
from functools import partial

import jax
import jax.numpy as jnp
from jax.experimental import pallas as pl
from jax.experimental.pallas import tpu as pltpu


def _sam_pool_kernel(patches_ref, w_ref, b_ref, out_ref, *, inv_p):
    """One (batch, patch-tile) grid step of patch-embed + GELU + mean-pool.

    patches_ref: (1, TP, Kp) bf16   im2col'd patch tile for image n
    w_ref:       (Kp, Ep)    bf16   patch-embedding weight (resident)
    b_ref:       (1, Ep)     f32    bias (resident)
    out_ref:     (1, 1, Ep)  f32    per-image accumulator / final pooled output
    """
    p = pl.program_id(1)
    n_p = pl.num_programs(1)

    @pl.when(p == 0)
    def _init():
        out_ref[...] = jnp.zeros_like(out_ref)

    x = patches_ref[0]                                    # (TP, Kp) bf16
    # Single 2-D MXU matmul with f32 accumulation.
    h = jnp.dot(x, w_ref[...], preferred_element_type=jnp.float32)  # (TP, Ep)
    h = h + b_ref[...]                                    # f32 bias (VPU)
    h = jax.nn.gelu(h, approximate=True)                  # f32 tanh-GELU (EUP)
    # Partial sum over this patch tile -> running sum in the resident out block.
    out_ref[0] += jnp.sum(h, axis=0, keepdims=True)       # (1, Ep)

    @pl.when(p == n_p - 1)
    def _finalize():
        # AdaptiveAvgPool2d(1) + Flatten == sum over patches * (1/P).
        out_ref[...] = out_ref[...] * inv_p


def _round_up(v, m):
    return ((v + m - 1) // m) * m


def _pick_tile(total, target):
    """Largest multiple-of-8 divisor of `total` <= target, else `total` itself."""
    tp = min(target, total)
    tp -= tp % 8
    while tp >= 8:
        if total % tp == 0:
            return tp
        tp -= 8
    return total  # full extent is always a legal block dim


@partial(jax.jit, static_argnames=("patch", "tile_p"))
def sam_wrapper_forward(x_nchw, w_patch, b_patch, patch, *, tile_p=512):
    """x_nchw: (N, C, H, W). Returns (N, E) f32 == Flatten(AvgPool(encoder(x)))."""
    N, C, H, W = x_nchw.shape
    K, E = w_patch.shape
    ph = pw = patch
    assert H % ph == 0 and W % pw == 0 and K == C * ph * pw
    Hp, Wp = H // ph, W // pw
    P = Hp * Wp

    Kp = _round_up(K, 128)           # lane-align the contraction dim
    Ep = _round_up(E, 128)           # lane-dense output dim
    TP = _pick_tile(P, tile_p)       # patch tile (sublane-aligned divisor of P)
    n_ptiles = P // TP

    # --- plain-JAX glue: im2col (NCHW -> (N, P, K)), matches Conv2d(stride=kernel=patch)
    patches = (
        x_nchw.reshape(N, C, Hp, ph, Wp, pw)
        .transpose(0, 2, 4, 1, 3, 5)                 # (N, Hp, Wp, C, ph, pw)
        .reshape(N, P, K)
    )
    if patches.dtype != jnp.float32:
        patches = patches.astype(jnp.float32)

    # Zero-pad K/E to multiples of 128; zero weight columns + zero bias mean the
    # padded E lanes hold gelu(0)=0, so padding never changes real outputs.
    patches_p = jnp.pad(patches, ((0, 0), (0, 0), (0, Kp - K))).astype(jnp.bfloat16)
    w_p = jnp.pad(w_patch.astype(jnp.float32),
                  ((0, Kp - K), (0, Ep - E))).astype(jnp.bfloat16)
    b_p = jnp.pad(b_patch.astype(jnp.float32), (0, Ep - E)).reshape(1, Ep)

    # VMEM budget: double-buffered bf16 patch tiles + resident bf16 weight +
    # small f32 bias/output blocks.  Cap well under v7x's 64 MiB physical VMEM.
    vmem_est = 2 * TP * Kp * 2 + Kp * Ep * 2 + 4 * Ep * 4
    vmem_limit = int(min(max(4 * vmem_est, 4 << 20), 32 << 20))

    cost = pl.CostEstimate(
        flops=2 * N * P * Kp * Ep,
        transcendentals=N * P * Ep,
        bytes_accessed=N * P * Kp * 2 + Kp * Ep * 2 + Ep * 4 + N * Ep * 4,
    )

    out3 = pl.pallas_call(
        partial(_sam_pool_kernel, inv_p=1.0 / P),
        out_shape=jax.ShapeDtypeStruct((N, 1, Ep), jnp.float32),
        grid=(N, n_ptiles),                               # reduction (P) axis last
        in_specs=[
            pl.BlockSpec((1, TP, Kp), lambda n, p: (n, p, 0)),   # patch tiles
            pl.BlockSpec((Kp, Ep), lambda n, p: (0, 0)),         # weight, resident
            pl.BlockSpec((1, Ep), lambda n, p: (0, 0)),          # bias, resident
        ],
        out_specs=pl.BlockSpec((1, 1, Ep), lambda n, p: (n, 0, 0)),  # accumulator
        compiler_params=pltpu.CompilerParams(
            dimension_semantics=("parallel", "arbitrary"),
            vmem_limit_bytes=vmem_limit,
        ),
        cost_estimate=cost,
    )(patches_p, w_p, b_p)

    return out3.reshape(N, Ep)[:, :E]


def _reference(x_nchw, w_patch, b_patch, patch):
    """Pure-JAX reference (same bf16 operand quantization as the kernel)."""
    N, C, H, W = x_nchw.shape
    K, E = w_patch.shape
    ph = pw = patch
    P = (H // ph) * (W // pw)
    patches = (
        x_nchw.reshape(N, C, H // ph, ph, W // pw, pw)
        .transpose(0, 2, 4, 1, 3, 5)
        .reshape(N, P, K)
    )
    h = jnp.einsum(
        "npk,ke->npe",
        patches.astype(jnp.bfloat16),
        w_patch.astype(jnp.bfloat16),
        preferred_element_type=jnp.float32,
    ) + b_patch[None, None, :].astype(jnp.float32)
    h = jax.nn.gelu(h, approximate=True)                 # encoder output, (N, P, E)
    # AdaptiveAvgPool2d(1) + Flatten on the NCHW feature map == mean over P.
    return jnp.mean(h, axis=1)                           # (N, E)


if __name__ == "__main__":
    # Small shapes consistent with the forward: batch=2, RGB 32x32 images,
    # patch=4 -> P=64 patches (tiled TP=32 -> 2 reduction steps), embed dim
    # E=32 (the "channel" dim that survives AdaptiveAvgPool2d(1) + Flatten).
    N, C, H, W = 2, 3, 32, 32
    patch, E = 4, 32
    K = C * patch * patch      # 48

    key = jax.random.PRNGKey(0)
    kx, kw, kb = jax.random.split(key, 3)
    x = jax.random.normal(kx, (N, C, H, W), dtype=jnp.float32)
    w_patch = jax.random.normal(kw, (K, E), dtype=jnp.float32) * 0.05
    b_patch = jax.random.normal(kb, (E,), dtype=jnp.float32) * 0.01

    out = sam_wrapper_forward(x, w_patch, b_patch, patch, tile_p=32)
    out = jax.block_until_ready(out)

    ref = _reference(x, w_patch, b_patch, patch)
    assert out.shape == (N, E), out.shape
    assert jnp.allclose(out, ref, atol=1e-3, rtol=1e-3), (
        float(jnp.max(jnp.abs(out - ref)))
    )
    print("KERNEL_OK")
</pallas_src>

<mosaic_0001>
module attributes {stable_mosaic.version = 11 : i64} {
  func.func @_sam_pool_kernel(%arg0: i32, %arg1: i32, %arg2: memref<1x32x128xbf16, #tpu.memory_space<vmem>>, %arg3: memref<128x128xbf16, #tpu.memory_space<vmem>>, %arg4: memref<1x128xf32, #tpu.memory_space<vmem>>, %arg5: memref<1x1x128xf32, #tpu.memory_space<vmem>>) attributes {dimension_semantics = [#tpu.dimension_semantics<parallel>, #tpu.dimension_semantics<arbitrary>], iteration_bounds = array<i64: 2, 2>, scalar_prefetch = 0 : i64, scratch_operands = 0 : i64, tpu.core_type = #tpu.core_type<tc>, window_params = [{transform_indices = @transform_0, window_bounds = array<i64: 1, 32, 128>}, {pipeline_mode = #tpu.pipeline_mode<synchronous>, transform_indices = @transform_1, window_bounds = array<i64: 128, 128>}, {pipeline_mode = #tpu.pipeline_mode<synchronous>, transform_indices = @transform_2, window_bounds = array<i64: 1, 128>}, {transform_indices = @transform_3, window_bounds = array<i64: 1, 1, 128>}]} {
    %c0_i32 = arith.constant 0 : i32
    %0 = arith.cmpi eq, %arg1, %c0_i32 : i32
    %1 = arith.extui %0 : i1 to i32
    %c0_i32_0 = arith.constant 0 : i32
    %2 = arith.cmpi ne, %1, %c0_i32_0 : i32
    scf.if %2 {
      %cst_19 = arith.constant 0.000000e+00 : f32
      %34 = vector.broadcast %cst_19 : f32 to vector<1x1x128xf32>
      %c0_20 = arith.constant 0 : index
      %c0_21 = arith.constant 0 : index
      %c0_22 = arith.constant 0 : index
      %35 = vector.load %arg5[%c0_20, %c0_21, %c0_22] : memref<1x1x128xf32, #tpu.memory_space<vmem>>, vector<1x1x128xf32>
      tpu.vector_store %arg5[%c0_20, %c0_21, %c0_22], %34 {strides = array<i32>} : memref<1x1x128xf32, #tpu.memory_space<vmem>>, vector<1x1x128xf32>,
    } else {
    }
    %c0 = arith.constant 0 : index
    %c0_1 = arith.constant 0 : index
    %c0_2 = arith.constant 0 : index
    %3 = vector.load %arg2[%c0, %c0_1, %c0_2] : memref<1x32x128xbf16, #tpu.memory_space<vmem>>, vector<1x32x128xbf16>
    %4 = vector.shape_cast %3 : vector<1x32x128xbf16> to vector<32x128xbf16>
    %c0_3 = arith.constant 0 : index
    %c0_4 = arith.constant 0 : index
    %5 = vector.load %arg3[%c0_3, %c0_4] : memref<128x128xbf16, #tpu.memory_space<vmem>>, vector<128x128xbf16>
    %cst = arith.constant dense<0.000000e+00> : vector<32x128xf32>
    %6 = tpu.matmul %4, %5, %cst {dimension_numbers = #tpu.dot_dimension_numbers<[1], [0], [0], [1], [0, 0, 1, 1], [], []>} : vector<32x128xbf16>, vector<128x128xbf16>, vector<32x128xf32> -> vector<32x128xf32>
    %c0_5 = arith.constant 0 : index
    %c0_6 = arith.constant 0 : index
    %7 = vector.load %arg4[%c0_5, %c0_6] : memref<1x128xf32, #tpu.memory_space<vmem>>, vector<1x128xf32>
    %8 = vector.broadcast %7 : vector<1x128xf32> to vector<32x128xf32>
    %9 = arith.addf %6, %8 : vector<32x128xf32>
    %10 = arith.mulf %9, %9 : vector<32x128xf32>
    %11 = arith.mulf %9, %10 : vector<32x128xf32>
    %cst_7 = arith.constant 4.471500e-02 : f32
    %12 = vector.broadcast %cst_7 : f32 to vector<32x128xf32>
    %13 = arith.mulf %12, %11 : vector<32x128xf32>
    %14 = arith.addf %9, %13 : vector<32x128xf32>
    %cst_8 = arith.constant 0.797884583 : f32
    %15 = vector.broadcast %cst_8 : f32 to vector<32x128xf32>
    %16 = arith.mulf %15, %14 : vector<32x128xf32>
    %17 = math.tanh %16 : vector<32x128xf32>
    %cst_9 = arith.constant 1.000000e+00 : f32
    %18 = vector.broadcast %cst_9 : f32 to vector<32x128xf32>
    %19 = arith.addf %18, %17 : vector<32x128xf32>
    %cst_10 = arith.constant 5.000000e-01 : f32
    %20 = vector.broadcast %cst_10 : f32 to vector<32x128xf32>
    %21 = arith.mulf %20, %19 : vector<32x128xf32>
    %22 = arith.mulf %9, %21 : vector<32x128xf32>
    %c0_11 = arith.constant 0 : index
    %c0_12 = arith.constant 0 : index
    %c0_13 = arith.constant 0 : index
    %23 = vector.load %arg5[%c0_11, %c0_12, %c0_13] : memref<1x1x128xf32, #tpu.memory_space<vmem>>, vector<1x1x128xf32>
    %24 = vector.shape_cast %23 : vector<1x1x128xf32> to vector<1x128xf32>
    %cst_14 = arith.constant dense<0.000000e+00> : vector<128xf32>
    %25 = vector.multi_reduction <add>, %22, %cst_14 [0] : vector<32x128xf32> to vector<128xf32>
    %26 = vector.shape_cast %25 : vector<128xf32> to vector<1x128xf32>
    %27 = arith.addf %24, %26 : vector<1x128xf32>
    %c0_15 = arith.constant 0 : index
    %c0_16 = arith.constant 0 : index
    %c0_17 = arith.constant 0 : index
    %28 = vector.load %arg5[%c0_15, %c0_16, %c0_17] : memref<1x1x128xf32, #tpu.memory_space<vmem>>, vector<1x1x128xf32>
    %29 = vector.shape_cast %28 : vector<1x1x128xf32> to vector<1x128xf32>
    %30 = vector.shape_cast %27 : vector<1x128xf32> to vector<1x1x128xf32>
    tpu.vector_store %arg5[%c0_15, %c0_16, %c0_17], %30 {strides = array<i32>} : memref<1x1x128xf32, #tpu.memory_space<vmem>>, vector<1x1x128xf32>,
    %c1_i32 = arith.constant 1 : i32
    %31 = arith.cmpi eq, %arg1, %c1_i32 : i32
    %32 = arith.extui %31 : i1 to i32
    %c0_i32_18 = arith.constant 0 : i32
    %33 = arith.cmpi ne, %32, %c0_i32_18 : i32
    scf.if %33 {
      %c0_19 = arith.constant 0 : index
      %c0_20 = arith.constant 0 : index
      %c0_21 = arith.constant 0 : index
      %34 = vector.load %arg5[%c0_19, %c0_20, %c0_21] : memref<1x1x128xf32, #tpu.memory_space<vmem>>, vector<1x1x128xf32>
      %cst_22 = arith.constant 1.562500e-02 : f32
      %35 = vector.broadcast %cst_22 : f32 to vector<1x1x128xf32>
      %36 = arith.mulf %34, %35 : vector<1x1x128xf32>
      %c0_23 = arith.constant 0 : index
      %c0_24 = arith.constant 0 : index
      %c0_25 = arith.constant 0 : index
      %37 = vector.load %arg5[%c0_23, %c0_24, %c0_25] : memref<1x1x128xf32, #tpu.memory_space<vmem>>, vector<1x1x128xf32>
      tpu.vector_store %arg5[%c0_23, %c0_24, %c0_25], %36 {strides = array<i32>} : memref<1x1x128xf32, #tpu.memory_space<vmem>>, vector<1x1x128xf32>,
    } else {
    }
    return
  }
  func.func @transform_0(%arg0: i32, %arg1: i32) -> (i32, i32, i32) {
    %c0_i32 = arith.constant 0 : i32
    %c0_i32_0 = arith.constant 0 : i32
    return %arg0, %arg1, %c0_i32 : i32, i32, i32
  }
  func.func @transform_1(%arg0: i32, %arg1: i32) -> (i32, i32) {
    %c0_i32 = arith.constant 0 : i32
    %c0_i32_0 = arith.constant 0 : i32
    %c0_i32_1 = arith.constant 0 : i32
    return %c0_i32, %c0_i32_0 : i32, i32
  }
  func.func @transform_2(%arg0: i32, %arg1: i32) -> (i32, i32) {
    %c0_i32 = arith.constant 0 : i32
    %c0_i32_0 = arith.constant 0 : i32
    %c0_i32_1 = arith.constant 0 : i32
    return %c0_i32, %c0_i32_0 : i32, i32
  }
  func.func @transform_3(%arg0: i32, %arg1: i32) -> (i32, i32, i32) {
    %c0_i32 = arith.constant 0 : i32
    %c0_i32_0 = arith.constant 0 : i32
    %c0_i32_1 = arith.constant 0 : i32
    return %arg0, %c0_i32, %c0_i32_0 : i32, i32, i32
  }
}

</mosaic_0001>

<bundles_post_ra>
// kernel: sam_wrapper_forward.1
= control target key start
LH: loop header
LB: loop body
LE: loop exit
PB: predicated region body
PF: predicated region fallthrough
CT: control target
= control target key end

     0   :  { %8 = vsyncpa [#allocation3], 0  ;;  %s871_s0 = inlined_call_operand.vmem [shape: bf16[2,64,128], index: 0, kind: input, shape index: {}]   ;;  %s872_s1 = inlined_call_operand.vmem [shape: bf16[128,128], index: 1, kind: input, shape index: {}]   ;;  %s873_s2 = inlined_call_operand.vmem [shape: f32[1,128], index: 2, kind: input, shape index: {}]   ;;  %s874_s3 = inlined_call_operand.hbm [shape: f32[2,1,128], index: 3, kind: output, shape index: {}]  }
   0x1   :  { %10 = vsyncpa [#allocation3 + $0x1], 0  ;;  %s712_s12 = smov 0   ;;  %s714_s13 = smov 0  }
   0x2   :  { %s716_s14 = smov 0   ;;  %s718_s15 = smov 0  }
   0x3   :  { %s720_s16 = smov 0   ;;  %s722_s17 = smov 0  }
   0x4   :  { %s724_s18 = smov 0   ;;  %s726_s19 = smov 0  }
   0x5 LB: > { %s444_s20 = sadd.s32 4294967295, %s689_s19   ;;  %s445_s21 = sadd.s32 4294967294, %s689_s19   ;;  %s689_s19 = sphi %s726_s19, %s16_s19   ;;  %s685_s18 = sphi %s724_s18, %s883_s18   ;;  %s681_s17 = sphi %s722_s17, %s882_s17   ;;  %s677_s16 = sphi %s720_s16, %s881_s16   ;;  %s673_s15 = sphi %s718_s15, %s880_s15   ;;  %s669_s14 = sphi %s716_s14, %s879_s14   ;;  %s665_s13 = sphi %s714_s13, %s878_s13   ;;  %s661_s12 = sphi %s712_s12, %s877_s12  }
   0x6   : > { %s25_s22 = sadd.s32 1, %s681_s17  ;;  %s28_s23 = sadd.s32 1, %s685_s18 }
   0x7   : > { %p26_p0 = scmp.ge.s32.totalorder %s25_s22, 2  ;;  %p115_p1 = scmp.ne.s32.totalorder %s669_s14, %s665_s13 }
   0x8   : > { %p116_p2 = scmp.eq.s32.totalorder %s444_s20, 3  ;;  %p121_p4 = scmp.ne.s32.totalorder %s665_s13, %s661_s12 }
   0x9   : > { %s885_s22 = smov (%p26_p0, %s25_s22), 0  ;;  %s887_s23 = smov (!%p26_p0, %s28_s23), %s685_s18 }
   0xa   : > { %p761_p3 = por %p116_p2, %p115_p1  ;;  %p30_p5 = scmp.ge.s32.totalorder %s887_s23, 2 }
   0xb   : > { %p122_p6 = scmp.eq.s32.totalorder %s445_s21, 3  ;;  %p448_p7 = scmp.ge.s32.totalorder %s689_s19, 1 }
   0xc   : > { %p159_p8 = scmp.lt.s32.totalorder %s689_s19, 5  ;;  %s889_s23 = smov (%p30_p5, %s887_s23), 0 }
   0xd   : > { %p771_p9 = por %p122_p6, %p121_p4  ;;  %s102_s26 = ssub.s32 %s685_s18, %s889_s23 }
   0xe   : > { %p160_p10 = pnand %p448_p7, %p159_p8  ;;  %s105_s27 = sadd.s32 1, %s669_s14 }
   0xf   : > { %p103_p11 = scmp.eq.s32.totalorder %s102_s26, 0  ;;  %s184_s29 = sand.u32 (!%p160_p10), 1, %s665_s13  }
  0x10   : > { %163 = sbr.rel (%p160_p10) target bundleno = 265 (0x109), region = 32  ;;  %s449_s30 = sshll.u32 (!%p160_p10), %s673_s15, 2 }
  0x11   : > { %s779_s28 = scalar_select %p103_p11, %s669_s14, %s105_s27  }
  0x12   : > { %p187_p12 = scmp.lt.s32.totalorder (!%p160_p10), %s677_s16, 1  ;;  %p189_p13 = scmp.lt.s32.totalorder (!%p160_p10), %s449_s30, 7 }
  0x13   : > { %s790_s11 = scalar_lea.vmem (!%p160_p10), [#allocation2], %s184_s29  ;;  %p452_p0 = scmp.ne.s32.totalorder (!%p160_p10), %s673_s15, 0 }
  0x15   : > { %s188_s4 = scalar_select %p187_p12, %s677_s16, 1 }
  0x16   : > { %s891_s30 = smov (!%p189_p13, %s449_s30), 7  ;;  %199 = sbr.rel (%p452_p0) target bundleno = 29 (0x1d), region = 36 }
  0x17   : > { %s450_s5 = sshll.u32 %s188_s4, 3 }
  0x18   : > { %s192_s6 = sadd.s32 %s450_s5, %s891_s30 }
  0x19   : > { %s451_s7 = sshll.u32 %s192_s6, 2 }
  0x1a   : > { %s194_s10 = scalar_lea.vmem %s871_s0, %s451_s7 }
  0x1b   : > { %v691_v0 = vmov 0.0  }
  0x1c   : > { %200 = vst [vmem:[%s790_s11] sm:$0x1] %v691_v0 }
  0x1d PF: > { %v505_v1 = vld [vmem:[%s872_s1 + $0x38] sm:$0xff]  ;;  %v504_v2 = vld [vmem:[%s872_s1 + $0x30] sm:$0xff]  ;;  %v503_v3 = vld [vmem:[%s872_s1 + $0x28] sm:$0xff]  ;;  %p493_p1 = scmp.ne.s32.totalorder %s673_s15, 1 }
  0x1e   : > { %285 = vmatpush.bf16.msra.mxu0 %v505_v1  ;;  %506 = vmatpush.bf16.msra.mxu1 %v505_v1  ;;  %v502_v4 = vld [vmem:[%s872_s1 + $0x20] sm:$0xff]  ;;  %v501_v5 = vld [vmem:[%s872_s1 + $0x18] sm:$0xff]  ;;  %v500_v6 = vld [vmem:[%s872_s1 + $0x10] sm:$0xff] }
  0x1f   : > { %v499_v7 = vld [vmem:[%s872_s1 + $0x8] sm:$0xff]  ;;  %v498_v8 = vld [vmem:[%s872_s1] sm:$0xff] }
  0x20   : > { %v496_v9 = vld [vmem:[%s194_s10] sm:$0xff]  ;;  %v497_v10 = vld [vmem:[%s194_s10 + $0x8] sm:$0xff] }
  0x21   : > { %v586_v11 = vld [vmem:[%s873_s2] ss:$0 sm:$0xff] }
  0x22   : > { %286 = vmatpush.bf16.msra.mxu0 %v504_v2  ;;  %507 = vmatpush.bf16.msra.mxu1 %v504_v2 }
  0x23   : > { %v340_v0 = vld [vmem:[%s790_s11] sm:$0x1] }
  0x26   : > { %287 = vmatpush.bf16.msra.mxu0 %v503_v3  ;;  %508 = vmatpush.bf16.msra.mxu1 %v503_v3 }
  0x2a   : > { %288 = vmatpush.bf16.msra.mxu0 %v502_v4  ;;  %509 = vmatpush.bf16.msra.mxu1 %v502_v4 }
  0x2e   : > { %289 = vmatpush.bf16.msra.mxu0 %v501_v5  ;;  %510 = vmatpush.bf16.msra.mxu1 %v501_v5 }
  0x32   : > { %290 = vmatpush.bf16.msra.mxu0 %v500_v6  ;;  %511 = vmatpush.bf16.msra.mxu1 %v500_v6 }
  0x36   : > { %291 = vmatpush.bf16.msra.mxu0 %v499_v7  ;;  %512 = vmatpush.bf16.msra.mxu1 %v499_v7 }
  0x3a   : > { %292 = vmatpush.bf16.msra.mxu0 %v498_v8  ;;  %513 = vmatpush.bf16.msra.mxu1 %v498_v8 }
  0x3d   : > { %293 = vmatmul.bf16.vlgmr.msra.gmra.mxu0 %v496_v9  ;;  %298 = vmatmul.bf16.vlgmr.msra.gmra.mxu1 %v497_v10 }
  0xba   : > { %v294_v12 = vpop.f32.mrf.mxu0  ;;  %v299_v13 = vpop.f32.mrf.mxu1 }
  0xbb   : > { %v295_v14 = vadd.f32 %v586_v11, %v294_v12  ;;  %v300_v15 = vadd.f32 %v586_v11, %v299_v13 }
  0xbd   : > { %v304_v16 = vmul.f32 %v295_v14, %v295_v14  ;;  %v306_v17 = vmul.f32 %v300_v15, %v300_v15 }
  0xbf   : > { %v308_v18 = vmul.f32 %v304_v16, %v295_v14  ;;  %v310_v19 = vmul.f32 %v306_v17, %v300_v15 }
  0xc1   : > { %v312_v20 = vmul.f32 0.044715, %v308_v18  ;;  %v314_v21 = vmul.f32 0.044715, %v310_v19 }
  0xc2   : > { %v296_v22 = vpop.f32.mrf.mxu0  ;;  %v301_v23 = vpop.f32.mrf.mxu1 }
  0xc3   : > { %v316_v24 = vadd.f32 %v312_v20, %v295_v14  ;;  %v318_v25 = vadd.f32 %v314_v21, %v300_v15  ;;  %v297_v26 = vadd.f32 %v586_v11, %v296_v22  ;;  %v302_v27 = vadd.f32 %v586_v11, %v301_v23 }
  0xc5   : > { %v320_v28 = vmul.f32 0.7978846, %v316_v24  ;;  %v305_v29 = vmul.f32 %v297_v26, %v297_v26  ;;  %v307_v30 = vmul.f32 %v302_v27, %v302_v27  ;;  %v322_v31 = vmul.f32 0.7978846, %v318_v25 }
  0xc7   : > { %v309_v32 = vmul.f32 %v305_v29, %v297_v26  ;;  %v311_v33 = vmul.f32 %v307_v30, %v302_v27  ;;  %587 = vtanh.f32 %v320_v28 }
  0xc8   : > { %589 = vtanh.f32 %v322_v31 }
  0xc9   : > { %v313_v34 = vmul.f32 0.044715, %v309_v32  ;;  %v315_v35 = vmul.f32 0.044715, %v311_v33 }
  0xcb   : > { %v317_v36 = vadd.f32 %v313_v34, %v297_v26  ;;  %v319_v37 = vadd.f32 %v315_v35, %v302_v27 }
  0xcd   : > { %v321_v38 = vmul.f32 0.7978846, %v317_v36  ;;  %v323_v39 = vmul.f32 0.7978846, %v319_v37  ;;  %v588_v40 = vpop.eup %587 }
  0xce   : > { %v590_v41 = vpop.eup %589  ;;  %v328_v42 = vadd.f32 1.0, %v588_v40 }
  0xcf   : > { %591 = vtanh.f32 %v321_v38  ;;  %v330_v43 = vadd.f32 1.0, %v590_v41 }
  0xd0   : > { %593 = vtanh.f32 %v323_v39  ;;  %v332_v46 = vmul.f32 0.5, %v328_v42 }
  0xd1   : > { %v334_v49 = vmul.f32 0.5, %v330_v43 }
  0xd2   : > { %v336_v51 = vmul.f32 %v332_v46, %v295_v14 }
  0xd3   : > { %v338_v54 = vmul.f32 %v334_v49, %v300_v15 }
  0xd5   : > { %v592_v44 = vpop.eup %591 }
  0xd6   : > { %v594_v45 = vpop.eup %593  ;;  %v329_v47 = vadd.f32 1.0, %v592_v44 }
  0xd7   : > { %v331_v48 = vadd.f32 1.0, %v594_v45 }
  0xd8   : > { %v333_v50 = vmul.f32 0.5, %v329_v47 }
  0xd9   : > { %v335_v53 = vmul.f32 0.5, %v331_v48 }
  0xda   : > { %v337_v52 = vmul.f32 %v333_v50, %v297_v26 }
  0xdb   : > { %v339_v56 = vmul.f32 %v335_v53, %v302_v27 }
  0xdc   : > { %v341_v55 = vadd.f32 %v337_v52, %v336_v51 }
  0xde   : > { %v342_v57 = vadd.f32 %v341_v55, %v338_v54 }
  0xe0   : > { %v343_v58 = vadd.f32 %v342_v57, %v339_v56 }
  0xe2   : > { %v344_v59 = vrot.slane %v343_v58, 4 }
  0xe4   : > { %v345_v60 = vadd.f32 %v344_v59, %v343_v58 }
  0xe6   : > { %v346_v61 = vrot.slane %v345_v60, 2 }
  0xe8   : > { %v347_v62 = vadd.f32 %v346_v61, %v345_v60 }
  0xea   : > { %v348_v63 = vrot.slane %v347_v62, 1 }
  0xec   : > { %v349_v1 = vadd.f32 %v348_v63, %v347_v62  ;;  %355 = sbr.rel (%p493_p1) target bundleno = 251 (0xfb), region = 40 }
  0xee   : > { %v350_v2 = vadd.f32 %v349_v1, %v340_v0 }
  0xf0   : > { %351 = vst [vmem:[%s790_s11] sm:$0x1] %v350_v2 }
  0xf7   : > { %v356_v3 = vld [vmem:[%s790_s11] sm:$0x1] }
  0xf8   : > { %v357_v4 = vmul.f32 0.015625, %v356_v3 }
  0xfa   : > { %358 = vst [vmem:[%s790_s11] sm:$0x1] %v357_v4 }
  0xfb PF: > { %s368_s7 = scalar_lea.hbm %s874_s3, %s677_s16  ;;  %s370_s8 = sshll.u32 %s790_s11, 4  ;;  %s371_s8 = int_to_ptr.vmem [resolvable:$true] %s370_s8 }
  0xfc   : > { %s372_s9 = sshll.u32 %s368_s7, 4  ;;  %s360_s15 = scalar_lea.sflag [#allocation3], %s184_s29  ;;  %s373_s9 = int_to_ptr.hbm [resolvable:$true] %s372_s9 }
  0xfd   : > { %s609_s20 = sshra.s32 %s373_s9, 4  ;;  %s615_s30 = scalar_lea.hbm %s874_s3, 2  ;;  %s610_s20 = int_to_ptr.hbm [resolvable:$true] %s609_s20 }
  0xfe   : > { %s611_s21 = scalar_lea.hbm %s610_s20, 1  ;;  %p616_p6 = scmp.lt.s32.totalorder %s610_s20, %s874_s3 }
  0xff   : > { %p612_p2 = scmp.ne.s32.totalorder %s610_s20, %s611_s21  ;;  %p617_p7 = scmp.lt.s32.totalorder %s615_s30, %s611_s21 }
 0x101   : > { %p613_p4 = pnand %p612_p2, %p761_p3  ;;  %p618_p8 = por %p617_p7, %p616_p6 }
 0x103   : > { %p614_p5 = pneg %p613_p4 }
 0x105   : > { %p619_p10 = pnand %p618_p8, %p614_p5 }
 0x107   : > { %622 = shalt.err (!%p619_p10)
}
 0x108   : > { %514 = dma.vmem_to_hbm [thread:$0]  (%p761_p3), %s371_s8, 16, %s373_s9, %s360_s15  }
 0x109 PF: > { %p520_p11 = scmp.ge.s32.totalorder %s689_s19, 2  ;;  %s384_s16 = sand.u32 1, %s661_s12  }
 0x10a   : > { %s385_s29 = scalar_lea.sflag [#allocation3], %s384_s16 }
 0x10b   : > { %p517_p12 = pnand %p520_p11, %p771_p9 }
 0x10d   : > { %p518_p13 = pneg %p517_p12 }
 0x10f   : > { %656 = dma.done.wait (%p518_p13), %s385_s29, 16  }
 0x110   : > { %658 = vsyncadd (%p518_p13), %s385_s29, 4294967280  ;;  %s16_s19 = sadd.s32 1, %s689_s19   ;;  %s877_s12 = smov %s665_s13 }
 0x111   : > { %p13_p0 = scmp.ge.s32.totalorder %s16_s19, 6   ;;  %s878_s13 = smov %s669_s14 }
 0x112   : > { %s879_s14 = smov %s779_s28  ;;  %s880_s15 = smov %s681_s17 }
 0x113   : > { %s881_s16 = smov %s685_s18  ;;  %s882_s17 = smov %s885_s22 }
 0x114   : > { %s883_s18 = smov %s889_s23  ;;  %15 = sbr.rel (!%p13_p0) target bundleno = 5 (0x5), region = 75 }
 0x119   :  { %390 = vsyncpa [#allocation3], 1 }
 0x11a   :  { %392 = vsyncpa [#allocation3 + $0x1], 1 }

</bundles_post_ra>
